<compile_context>
chip_gen: v7x
topology: tpu7x:2x2x1
jax: 0.10.0
libtpu: 0.0.40
codegen_flags: <defaults>
</compile_context>

<pallas_src>
import math

import jax
import jax.numpy as jnp
from jax.experimental import pallas as pl
from jax.experimental.pallas import tpu as pltpu

# --------------- configuration (ConditionalCouplingLayer(dim=16)) ------------
DIM = 16                       # flow feature dim
TF = DIM // 2                  # transformed_features = 8
NPAR = DIM - TF                # num_params           = 8
HID = max(NPAR, TF) * 4        # MLP hidden width      = 32 (== condition width)

# dtype fed to the MXU.  f32 keeps bit-parity with the reference; on v5e set
# to jnp.bfloat16 for a faster single-pass MXU (and loosen the tolerance).
DOT_DTYPE = jnp.float32


def _dot(w, x):
    return jnp.dot(w.astype(DOT_DTYPE), x.astype(DOT_DTYPE),
                   preferred_element_type=jnp.float32)


def _sigmoid(v):
    # exp and reciprocal both live on the EUP slot; avoids the VPU divide of
    # the default jax.nn.sigmoid lowering.
    return pl.reciprocal(1.0 + jnp.exp(-v), approx=True)


# --------------------------------- kernel ------------------------------------
def coupling_kernel(x_ref, cond_ref, wk8_ref, wk32_ref, b_ref, out_ref):
    """out = [x1 + ConditionalMLP(x2, cond) ; x2]   (feature-major tiles)."""
    x1 = x_ref[:TF, :]                         # [8,  TILE_B]
    x2 = x_ref[TF:, :]                         # [8,  TILE_B]

    # zero-cost static sublane slices of the packed, VMEM-resident buffers
    w1 = wk8_ref[...]                          # [32, 8]   pre_layers[0]
    w2 = wk32_ref[0 * HID:1 * HID, :]          # [32, 32]  pre_layers[2]
    we = wk32_ref[1 * HID:2 * HID, :]          # [32, 32]  emb_layers[1]
    w3 = wk32_ref[2 * HID:3 * HID, :]          # [32, 32]  post_layers[1]
    w4 = wk32_ref[3 * HID:3 * HID + TF, :]     # [8,  32]  post_layers[3]
    b1 = b_ref[0 * HID:1 * HID, :]             # [32, 1] columns, lane-broadcast
    b2 = b_ref[1 * HID:2 * HID, :]
    be = b_ref[2 * HID:3 * HID, :]
    b3 = b_ref[3 * HID:4 * HID, :]
    b4 = b_ref[4 * HID:4 * HID + TF, :]

    # emb_layers: SiLU -> Linear
    c = cond_ref[...]                          # [32, TILE_B]
    c = _dot(we, c * _sigmoid(c)) + be

    # pre_layers: Linear -> Sigmoid -> Linear
    h = _sigmoid(_dot(w1, x2) + b1)
    h = _dot(w2, h) + b2
    # x + condition, then post_layers: Sigmoid -> Linear -> Sigmoid -> Linear
    h = _sigmoid(h + c)
    h = _sigmoid(_dot(w3, h) + b3)
    h = _dot(w4, h) + b4                       # [8, TILE_B]

    out_ref[:TF, :] = x1 + h                   # lane-dense, sublane-aligned
    out_ref[TF:, :] = x2


# ------------------------------ wrapper / glue --------------------------------
def _pick_tile(batch, desired=512):
    """Largest 128-multiple tile <= desired, keeping >=2 grid steps (v7x TCs)."""
    b128 = pl.cdiv(batch, 128) * 128
    tile = min(desired, b128)
    if b128 >= 256:                            # keep both v7x TensorCores busy
        tile = min(tile, (b128 // 2) // 128 * 128)
    return max(tile, 128)


def coupling_forward_fm(x_fm, cond_fm, packed, tile_b=None):
    """Feature-major forward.  x_fm: [DIM, B], cond_fm: [HID, B] -> [DIM, B].

    (A batch-major caller just wraps this with x.T / out.T; the hot path
     itself has no transposes and no pads when B is a tile multiple.)
    """
    wk8, wk32, b_all = packed
    B = x_fm.shape[1]
    tile_b = tile_b or _pick_tile(B)
    b_pad = pl.cdiv(B, tile_b) * tile_b
    if b_pad != B:                             # no-op branch for the demo shapes
        x_fm = jnp.pad(x_fm, ((0, 0), (0, b_pad - B)))
        cond_fm = jnp.pad(cond_fm, ((0, 0), (0, b_pad - B)))

    def resident(arr):
        # same block every grid step -> stays VMEM-resident across the batch grid
        return pl.BlockSpec(arr.shape, lambda b: (0, 0))

    out_fm = pl.pallas_call(
        coupling_kernel,
        out_shape=jax.ShapeDtypeStruct((DIM, b_pad), jnp.float32),
        grid_spec=pltpu.PrefetchScalarGridSpec(
            num_scalar_prefetch=0,
            grid=(b_pad // tile_b,),
            in_specs=[pl.BlockSpec((DIM, tile_b), lambda b: (0, b)),   # x tile
                      pl.BlockSpec((HID, tile_b), lambda b: (0, b)),   # cond tile
                      resident(wk8), resident(wk32), resident(b_all)],
            out_specs=pl.BlockSpec((DIM, tile_b), lambda b: (0, b)),
        ),
        compiler_params=pltpu.CompilerParams(
            dimension_semantics=("parallel",)),   # batch tiles shard on v7x's 2 TCs
    )(x_fm, cond_fm, wk8, wk32, b_all)

    return out_fm if b_pad == B else out_fm[:, :B]


# ------------------------- parameter init / packing --------------------------
def init_params(key):
    ks = iter(jax.random.split(key, 16))

    def linear(in_f, out_f):
        # nn.Linear default init: U(-1/sqrt(in), 1/sqrt(in)); weight [out, in]
        bound = 1.0 / math.sqrt(in_f)
        w = jax.random.uniform(next(ks), (out_f, in_f), jnp.float32, -bound, bound)
        b = jax.random.uniform(next(ks), (out_f,), jnp.float32, -bound, bound)
        return w, b

    w1, b1 = linear(NPAR, HID)    # pre_layers[0]
    w2, b2 = linear(HID, HID)     # pre_layers[2]
    we, be = linear(HID, HID)     # emb_layers[1]
    w3, b3 = linear(HID, HID)     # post_layers[1]
    w4, b4 = linear(HID, TF)      # post_layers[3]
    return dict(w1=w1, b1=b1, w2=w2, b2=b2, we=we, be=be,
                w3=w3, b3=b3, w4=w4, b4=b4)


def pack_params(p):
    """Concatenate the 10 tensors into 3 VMEM-resident buffers (done once)."""
    wk8 = p["w1"]                                                      # [32, 8]
    wk32 = jnp.concatenate([p["w2"], p["we"], p["w3"], p["w4"]], 0)    # [104, 32]
    b_all = jnp.concatenate(
        [p["b1"], p["b2"], p["be"], p["b3"], p["b4"]])[:, None]        # [136, 1]
    return wk8, wk32, b_all


# ------------------------- pure-JAX reference (module) -----------------------
def coupling_reference(x, cond, p):
    """Batch-major ConditionalCouplingLayer.forward, straight from the spec."""
    x1, x2 = x[:, :TF], x[:, TF:]
    h = jax.nn.sigmoid(x2 @ p["w1"].T + p["b1"])
    h = h @ p["w2"].T + p["b2"]
    c = jax.nn.silu(cond) @ p["we"].T + p["be"]
    h = jax.nn.sigmoid(h + c)
    h = jax.nn.sigmoid(h @ p["w3"].T + p["b3"])
    h = h @ p["w4"].T + p["b4"]
    return jnp.concatenate([x1 + h, x2], axis=1)


# ----------------------------------- main ------------------------------------
if __name__ == "__main__":
    key = jax.random.PRNGKey(0)
    k_params, k_x, k_c = jax.random.split(key, 3)

    params = init_params(k_params)
    packed = pack_params(params)             # packed once, outside the hot path

    BATCH = 512                              # -> TILE_B = 256, grid = (2,)
    # feature-major end-to-end: no wrapper transposes/pads in the hot path
    x_fm = jax.random.normal(k_x, (DIM, BATCH), jnp.float32)      # [16, 512]
    cond_fm = jax.random.normal(k_c, (HID, BATCH), jnp.float32)   # [32, 512]

    fwd = jax.jit(coupling_forward_fm)
    out_fm = jax.block_until_ready(fwd(x_fm, cond_fm, packed))

    ref = coupling_reference(x_fm.T, cond_fm.T, params)
    assert out_fm.shape == (DIM, BATCH)
    # tolerance covers the TPU's default bf16-pass MXU plus the approx EUP
    # reciprocal used inside the kernel's sigmoid/SiLU
    assert jnp.allclose(out_fm.T, ref, atol=5e-3, rtol=5e-3), \
        "mismatch vs JAX reference"

    print("KERNEL_OK")
</pallas_src>

<mosaic_0001>
module attributes {stable_mosaic.version = 11 : i64} {
  func.func @coupling_kernel(%arg0: i32, %arg1: memref<16x256xf32, #tpu.memory_space<vmem>>, %arg2: memref<32x256xf32, #tpu.memory_space<vmem>>, %arg3: memref<32x8xf32, #tpu.memory_space<vmem>>, %arg4: memref<104x32xf32, #tpu.memory_space<vmem>>, %arg5: memref<136x1xf32, #tpu.memory_space<vmem>>, %arg6: memref<16x256xf32, #tpu.memory_space<vmem>>) attributes {dimension_semantics = [#tpu.dimension_semantics<parallel>], iteration_bounds = array<i64: 2>, scalar_prefetch = 0 : i64, scratch_operands = 0 : i64, tpu.core_type = #tpu.core_type<tc>, window_params = [{transform_indices = @transform_0, window_bounds = array<i64: 16, 256>}, {transform_indices = @transform_1, window_bounds = array<i64: 32, 256>}, {pipeline_mode = #tpu.pipeline_mode<synchronous>, transform_indices = @transform_2, window_bounds = array<i64: 32, 8>}, {pipeline_mode = #tpu.pipeline_mode<synchronous>, transform_indices = @transform_3, window_bounds = array<i64: 104, 32>}, {pipeline_mode = #tpu.pipeline_mode<synchronous>, transform_indices = @transform_4, window_bounds = array<i64: 136, 1>}, {transform_indices = @transform_5, window_bounds = array<i64: 16, 256>}]} {
    %c0 = arith.constant 0 : index
    %c0_0 = arith.constant 0 : index
    %0 = vector.load %arg1[%c0, %c0_0] : memref<16x256xf32, #tpu.memory_space<vmem>>, vector<8x256xf32>
    %c8 = arith.constant 8 : index
    %c0_1 = arith.constant 0 : index
    %1 = vector.load %arg1[%c8, %c0_1] : memref<16x256xf32, #tpu.memory_space<vmem>>, vector<8x256xf32>
    %c0_2 = arith.constant 0 : index
    %c0_3 = arith.constant 0 : index
    %2 = vector.load %arg3[%c0_2, %c0_3] : memref<32x8xf32, #tpu.memory_space<vmem>>, vector<32x8xf32>
    %c0_4 = arith.constant 0 : index
    %c0_5 = arith.constant 0 : index
    %3 = vector.load %arg4[%c0_4, %c0_5] : memref<104x32xf32, #tpu.memory_space<vmem>>, vector<32x32xf32>
    %c32 = arith.constant 32 : index
    %c0_6 = arith.constant 0 : index
    %4 = vector.load %arg4[%c32, %c0_6] : memref<104x32xf32, #tpu.memory_space<vmem>>, vector<32x32xf32>
    %c64 = arith.constant 64 : index
    %c0_7 = arith.constant 0 : index
    %5 = vector.load %arg4[%c64, %c0_7] : memref<104x32xf32, #tpu.memory_space<vmem>>, vector<32x32xf32>
    %c96 = arith.constant 96 : index
    %c0_8 = arith.constant 0 : index
    %6 = vector.load %arg4[%c96, %c0_8] : memref<104x32xf32, #tpu.memory_space<vmem>>, vector<8x32xf32>
    %c0_9 = arith.constant 0 : index
    %c0_10 = arith.constant 0 : index
    %7 = vector.load %arg5[%c0_9, %c0_10] : memref<136x1xf32, #tpu.memory_space<vmem>>, vector<32x1xf32>
    %c32_11 = arith.constant 32 : index
    %c0_12 = arith.constant 0 : index
    %8 = vector.load %arg5[%c32_11, %c0_12] : memref<136x1xf32, #tpu.memory_space<vmem>>, vector<32x1xf32>
    %c64_13 = arith.constant 64 : index
    %c0_14 = arith.constant 0 : index
    %9 = vector.load %arg5[%c64_13, %c0_14] : memref<136x1xf32, #tpu.memory_space<vmem>>, vector<32x1xf32>
    %c96_15 = arith.constant 96 : index
    %c0_16 = arith.constant 0 : index
    %10 = vector.load %arg5[%c96_15, %c0_16] : memref<136x1xf32, #tpu.memory_space<vmem>>, vector<32x1xf32>
    %c128 = arith.constant 128 : index
    %c0_17 = arith.constant 0 : index
    %11 = vector.load %arg5[%c128, %c0_17] : memref<136x1xf32, #tpu.memory_space<vmem>>, vector<8x1xf32>
    %c0_18 = arith.constant 0 : index
    %c0_19 = arith.constant 0 : index
    %12 = vector.load %arg2[%c0_18, %c0_19] : memref<32x256xf32, #tpu.memory_space<vmem>>, vector<32x256xf32>
    %cst = arith.constant 0.000000e+00 : f32
    %13 = vector.broadcast %cst : f32 to vector<32x256xf32>
    %14 = arith.subf %13, %12 : vector<32x256xf32>
    %15 = math.exp %14 : vector<32x256xf32>
    %cst_20 = arith.constant 1.000000e+00 : f32
    %16 = vector.broadcast %cst_20 : f32 to vector<32x256xf32>
    %17 = arith.addf %16, %15 : vector<32x256xf32>
    %18 = tpu.reciprocal %17 {approx = true} : vector<32x256xf32> -> vector<32x256xf32>
    %19 = arith.mulf %12, %18 : vector<32x256xf32>
    %cst_21 = arith.constant dense<0.000000e+00> : vector<32x256xf32>
    %20 = tpu.matmul %4, %19, %cst_21 {dimension_numbers = #tpu.dot_dimension_numbers<[1], [0], [0], [1], [0, 0, 1, 1], [], []>} : vector<32x32xf32>, vector<32x256xf32>, vector<32x256xf32> -> vector<32x256xf32>
    %21 = vector.broadcast %9 : vector<32x1xf32> to vector<32x256xf32>
    %22 = arith.addf %20, %21 : vector<32x256xf32>
    %cst_22 = arith.constant dense<0.000000e+00> : vector<32x256xf32>
    %23 = tpu.matmul %2, %1, %cst_22 {dimension_numbers = #tpu.dot_dimension_numbers<[1], [0], [0], [1], [0, 0, 1, 1], [], []>} : vector<32x8xf32>, vector<8x256xf32>, vector<32x256xf32> -> vector<32x256xf32>
    %24 = vector.broadcast %7 : vector<32x1xf32> to vector<32x256xf32>
    %25 = arith.addf %23, %24 : vector<32x256xf32>
    %cst_23 = arith.constant 0.000000e+00 : f32
    %26 = vector.broadcast %cst_23 : f32 to vector<32x256xf32>
    %27 = arith.subf %26, %25 : vector<32x256xf32>
    %28 = math.exp %27 : vector<32x256xf32>
    %cst_24 = arith.constant 1.000000e+00 : f32
    %29 = vector.broadcast %cst_24 : f32 to vector<32x256xf32>
    %30 = arith.addf %29, %28 : vector<32x256xf32>
    %31 = tpu.reciprocal %30 {approx = true} : vector<32x256xf32> -> vector<32x256xf32>
    %cst_25 = arith.constant dense<0.000000e+00> : vector<32x256xf32>
    %32 = tpu.matmul %3, %31, %cst_25 {dimension_numbers = #tpu.dot_dimension_numbers<[1], [0], [0], [1], [0, 0, 1, 1], [], []>} : vector<32x32xf32>, vector<32x256xf32>, vector<32x256xf32> -> vector<32x256xf32>
    %33 = vector.broadcast %8 : vector<32x1xf32> to vector<32x256xf32>
    %34 = arith.addf %32, %33 : vector<32x256xf32>
    %35 = arith.addf %34, %22 : vector<32x256xf32>
    %cst_26 = arith.constant 0.000000e+00 : f32
    %36 = vector.broadcast %cst_26 : f32 to vector<32x256xf32>
    %37 = arith.subf %36, %35 : vector<32x256xf32>
    %38 = math.exp %37 : vector<32x256xf32>
    %cst_27 = arith.constant 1.000000e+00 : f32
    %39 = vector.broadcast %cst_27 : f32 to vector<32x256xf32>
    %40 = arith.addf %39, %38 : vector<32x256xf32>
    %41 = tpu.reciprocal %40 {approx = true} : vector<32x256xf32> -> vector<32x256xf32>
    %cst_28 = arith.constant dense<0.000000e+00> : vector<32x256xf32>
    %42 = tpu.matmul %5, %41, %cst_28 {dimension_numbers = #tpu.dot_dimension_numbers<[1], [0], [0], [1], [0, 0, 1, 1], [], []>} : vector<32x32xf32>, vector<32x256xf32>, vector<32x256xf32> -> vector<32x256xf32>
    %43 = vector.broadcast %10 : vector<32x1xf32> to vector<32x256xf32>
    %44 = arith.addf %42, %43 : vector<32x256xf32>
    %cst_29 = arith.constant 0.000000e+00 : f32
    %45 = vector.broadcast %cst_29 : f32 to vector<32x256xf32>
    %46 = arith.subf %45, %44 : vector<32x256xf32>
    %47 = math.exp %46 : vector<32x256xf32>
    %cst_30 = arith.constant 1.000000e+00 : f32
    %48 = vector.broadcast %cst_30 : f32 to vector<32x256xf32>
    %49 = arith.addf %48, %47 : vector<32x256xf32>
    %50 = tpu.reciprocal %49 {approx = true} : vector<32x256xf32> -> vector<32x256xf32>
    %cst_31 = arith.constant dense<0.000000e+00> : vector<8x256xf32>
    %51 = tpu.matmul %6, %50, %cst_31 {dimension_numbers = #tpu.dot_dimension_numbers<[1], [0], [0], [1], [0, 0, 1, 1], [], []>} : vector<8x32xf32>, vector<32x256xf32>, vector<8x256xf32> -> vector<8x256xf32>
    %52 = vector.broadcast %11 : vector<8x1xf32> to vector<8x256xf32>
    %53 = arith.addf %51, %52 : vector<8x256xf32>
    %54 = arith.addf %0, %53 : vector<8x256xf32>
    %c0_32 = arith.constant 0 : index
    %c0_33 = arith.constant 0 : index
    %55 = vector.load %arg6[%c0_32, %c0_33] : memref<16x256xf32, #tpu.memory_space<vmem>>, vector<8x256xf32>
    tpu.vector_store %arg6[%c0_32, %c0_33], %54 {strides = array<i32>} : memref<16x256xf32, #tpu.memory_space<vmem>>, vector<8x256xf32>,
    %c8_34 = arith.constant 8 : index
    %c0_35 = arith.constant 0 : index
    %56 = vector.load %arg6[%c8_34, %c0_35] : memref<16x256xf32, #tpu.memory_space<vmem>>, vector<8x256xf32>
    tpu.vector_store %arg6[%c8_34, %c0_35], %1 {strides = array<i32>} : memref<16x256xf32, #tpu.memory_space<vmem>>, vector<8x256xf32>,
    return
  }
  func.func @transform_0(%arg0: i32) -> (i32, i32) {
    %c0_i32 = arith.constant 0 : i32
    %c0_i32_0 = arith.constant 0 : i32
    return %c0_i32, %arg0 : i32, i32
  }
  func.func @transform_1(%arg0: i32) -> (i32, i32) {
    %c0_i32 = arith.constant 0 : i32
    %c0_i32_0 = arith.constant 0 : i32
    return %c0_i32, %arg0 : i32, i32
  }
  func.func @transform_2(%arg0: i32) -> (i32, i32) {
    %c0_i32 = arith.constant 0 : i32
    %c0_i32_0 = arith.constant 0 : i32
    %c0_i32_1 = arith.constant 0 : i32
    return %c0_i32, %c0_i32_0 : i32, i32
  }
  func.func @transform_3(%arg0: i32) -> (i32, i32) {
    %c0_i32 = arith.constant 0 : i32
    %c0_i32_0 = arith.constant 0 : i32
    %c0_i32_1 = arith.constant 0 : i32
    return %c0_i32, %c0_i32_0 : i32, i32
  }
  func.func @transform_4(%arg0: i32) -> (i32, i32) {
    %c0_i32 = arith.constant 0 : i32
    %c0_i32_0 = arith.constant 0 : i32
    %c0_i32_1 = arith.constant 0 : i32
    return %c0_i32, %c0_i32_0 : i32, i32
  }
  func.func @transform_5(%arg0: i32) -> (i32, i32) {
    %c0_i32 = arith.constant 0 : i32
    %c0_i32_0 = arith.constant 0 : i32
    return %c0_i32, %arg0 : i32, i32
  }
}

</mosaic_0001>

<bundles_post_ra>
// kernel: coupling_forward_fm.1
= control target key start
LH: loop header
LB: loop body
LE: loop exit
PB: predicated region body
PF: predicated region fallthrough
CT: control target
= control target key end

     0   :  { %10 = vsyncpa [#allocation5], 0  ;;  %s1841_s0 = inlined_call_operand.vmem [shape: f32[16,512], index: 0, kind: input, shape index: {}]   ;;  %s1842_s1 = inlined_call_operand.vmem [shape: f32[32,512], index: 1, kind: input, shape index: {}]   ;;  %s1843_s2 = inlined_call_operand.vmem [shape: f32[32,8], index: 2, kind: input, shape index: {}]   ;;  %s1844_s3 = inlined_call_operand.vmem [shape: f32[104,32], index: 3, kind: input, shape index: {}]   ;;  %s1845_s4 = inlined_call_operand.vmem [shape: f32[136,1], index: 4, kind: input, shape index: {}]   ;;  %s1846_s5 = inlined_call_operand.hbm [shape: f32[16,512], index: 5, kind: output, shape index: {}]  }
   0x1   :  { %12 = vsyncpa [#allocation5 + $0x1], 0  ;;  %s1567_s18 = smov 0   ;;  %s1569_s19 = smov 0  }
   0x2   :  { %s1571_s20 = smov 0   ;;  %s1573_s21 = smov 0  }
   0x3 LB: > { %s1198_s22 = sadd.s32 4294967295, %s1529_s21   ;;  %s1199_s23 = sadd.s32 4294967294, %s1529_s21   ;;  %s1529_s21 = sphi %s1573_s21, %s1853_s21   ;;  %s1525_s20 = sphi %s1571_s20, %s1852_s20   ;;  %s1521_s19 = sphi %s1569_s19, %s1851_s19   ;;  %s1517_s18 = sphi %s1567_s18, %s1850_s18  }
   0x4   : > { %s1590_s24 = sadd.s32 1, %s1529_s21   ;;  %s25_s25 = sadd.s32 1, %s1525_s20 }
   0x5   : > { %s22_s26 = ssub.s32 %s1529_s21, %s1590_s24  ;;  %p32_p0 = scmp.ne.s32.totalorder %s1525_s20, %s1521_s19 }
   0x6   : > { %p23_p1 = scmp.eq.s32.totalorder %s22_s26, 0  ;;  %p33_p2 = scmp.eq.s32.totalorder %s1529_s21, 0 }
   0x7   : > { %p151_p3 = scmp.eq.s32.totalorder %s1198_s22, 1  ;;  %p156_p4 = scmp.ne.s32.totalorder %s1521_s19, %s1517_s18 }
   0x8   : > { %s1603_s27 = scalar_select %p23_p1, %s1525_s20, %s25_s25  }
   0x9   : > { %p1605_p5 = por %p33_p2, %p32_p0  ;;  %p1609_p6 = por %p151_p3, %p32_p0 }
   0xa   : > { %p157_p7 = scmp.eq.s32.totalorder %s1199_s23, 1  ;;  %p1201_p9 = scmp.ge.s32.totalorder %s1529_s21, 2 }
   0xc   : > { %p1613_p8 = por %p157_p7, %p156_p4  ;;  %182 = sbr.rel (%p1201_p9) target bundleno = 34 (0x22), region = 28 }
  0x13   : > { %185 = sbr.rel (!%p1605_p5) target bundleno = 26 (0x1a), region = 32  ;;  %s187_s6 = sand.u32 (%p1605_p5), 1, %s1525_s20  }
  0x14   : > { %s1234_s7 = sshll.u32 (%p1605_p5), %s1529_s21, 4  ;;  %s1202_s8 = sshll.u32 (%p1605_p5), %s187_s6, 5 }
  0x15   : > { %s192_s11 = scalar_lea.vmem (%p1605_p5), %s1841_s0, %s1234_s7  ;;  %s189_s12 = scalar_lea.vmem (%p1605_p5), [#allocation2], %s1202_s8 }
  0x16   : > { %v205_v0 = vld [vmem:[%s192_s11] sm:$0xff] (%p1605_p5)  ;;  %v207_v1 = vld [vmem:[%s192_s11 + $0x8] sm:$0xff] (%p1605_p5) }
  0x17   : > { %v209_v2 = vld [vmem:[%s192_s11 + $0x20] sm:$0xff] (%p1605_p5)  ;;  %206 = vst [vmem:[%s189_s12] sm:$0xff] (%p1605_p5), %v205_v0  ;;  %208 = vst [vmem:[%s189_s12 + $0x8] sm:$0xff] (%p1605_p5), %v207_v1  ;;  %v211_v3 = vld [vmem:[%s192_s11 + $0x28] sm:$0xff] (%p1605_p5) }
  0x18   : > { %210 = vst [vmem:[%s189_s12 + $0x10] sm:$0xff] (%p1605_p5), %v209_v2  ;;  %212 = vst [vmem:[%s189_s12 + $0x18] sm:$0xff] (%p1605_p5), %v211_v3 }
  0x1a PF: > { %218 = sbr.rel (!%p1605_p5) target bundleno = 34 (0x22), region = 55  ;;  %s220_s13 = sand.u32 (%p1605_p5), 1, %s1525_s20  }
  0x1b   : > { %s1235_s14 = sshll.u32 (%p1605_p5), %s1529_s21, 4  ;;  %s1205_s15 = sshll.u32 (%p1605_p5), %s220_s13, 6 }
  0x1c   : > { %s225_s23 = scalar_lea.vmem (%p1605_p5), %s1842_s1, %s1235_s14  ;;  %s222_s25 = scalar_lea.vmem (%p1605_p5), [#allocation3], %s1205_s15 }
  0x1d   : > { %v238_v4 = vld [vmem:[%s225_s23] sm:$0xff] (%p1605_p5)  ;;  %v240_v5 = vld [vmem:[%s225_s23 + $0x8] sm:$0xff] (%p1605_p5) }
  0x1e   : > { %v242_v6 = vld [vmem:[%s225_s23 + $0x20] sm:$0xff] (%p1605_p5)  ;;  %239 = vst [vmem:[%s222_s25] sm:$0xff] (%p1605_p5), %v238_v4  ;;  %241 = vst [vmem:[%s222_s25 + $0x8] sm:$0xff] (%p1605_p5), %v240_v5  ;;  %v244_v7 = vld [vmem:[%s225_s23 + $0x28] sm:$0xff] (%p1605_p5) }
  0x1f   : > { %243 = vst [vmem:[%s222_s25 + $0x10] sm:$0xff] (%p1605_p5), %v242_v6  ;;  %v246_v8 = vld [vmem:[%s225_s23 + $0x40] sm:$0xff] (%p1605_p5)  ;;  %v248_v9 = vld [vmem:[%s225_s23 + $0x48] sm:$0xff] (%p1605_p5)  ;;  %245 = vst [vmem:[%s222_s25 + $0x18] sm:$0xff] (%p1605_p5), %v244_v7 }
  0x20   : > { %247 = vst [vmem:[%s222_s25 + $0x20] sm:$0xff] (%p1605_p5), %v246_v8  ;;  %249 = vst [vmem:[%s222_s25 + $0x28] sm:$0xff] (%p1605_p5), %v248_v9  ;;  %v250_v10 = vld [vmem:[%s225_s23 + $0x60] sm:$0xff] (%p1605_p5)  ;;  %v252_v11 = vld [vmem:[%s225_s23 + $0x68] sm:$0xff] (%p1605_p5) }
  0x21   : > { %251 = vst [vmem:[%s222_s25 + $0x30] sm:$0xff] %v250_v10  ;;  %253 = vst [vmem:[%s222_s25 + $0x38] sm:$0xff] %v252_v11 }
  0x22 PF: > { %p1208_p10 = scmp.ge.s32.totalorder %s1529_s21, 1  ;;  %p258_p11 = scmp.lt.s32.totalorder %s1529_s21, 3 }
  0x24   : > { %p259_p12 = pnand %p1208_p10, %p258_p11 }
  0x25   : > { %s1637_s26 = sand.u32 (!%p259_p12), 1, %s1521_s19   ;;  %v1531_v12 = vmov (!%p259_p12), 0.0   ;;  %v327_v13 = vld [vmem:[%s1845_s4] sm:$0xff] (!%p259_p12)  ;;  %v1532_v14 = vmov (!%p259_p12), 0   ;;  %v329_v15 = vld [vmem:[%s1845_s4 + $0x10] sm:$0xff] (!%p259_p12)  ;;  %vm542_vm0 = vcmask (!%p259_p12), 64512  }
  0x26   : > { %262 = sbr.rel (%p259_p12) target bundleno = 1062 (0x426), region = 78  ;;  %s1209_s28 = sshll.u32 (!%p259_p12), %s1637_s26, 5  ;;  %619 = vmatprep.mubr.f32.mxu1 (!%p259_p12), %v1531_v12  ;;  %497 = vmatprep.mubr.f32.mxu0 (!%p259_p12), %v1531_v12  ;;  %v310_v18 = vld [vmem:[%s1843_s2] sm:$0xff] (!%p259_p12)  ;;  %v328_v19 = vld [vmem:[%s1845_s4 + $0x8] sm:$0xff] (!%p259_p12)  ;;  %v330_v20 = vld [vmem:[%s1845_s4 + $0x18] sm:$0xff] (!%p259_p12)  ;;  %vm420_vm1 = vcmask (!%p259_p12), 261120  }
  0x27   : > { %1337 = vset.pattern.permute.xlu0 (!%p259_p12), %v1532_v14  ;;  %1338 = vset.pattern.permute.xlu1 (!%p259_p12), %v1532_v14  ;;  %s1648_s10 = scalar_lea.vmem (!%p259_p12), [#allocation2], %s1209_s28  ;;  %s1655_s13 = scalar_lea.vmem (!%p259_p12), [#allocation4], %s1209_s28  ;;  %v311_v21 = vld [vmem:[%s1843_s2 + $0x8] sm:$0xff] (!%p259_p12)  ;;  %v335_v22 = vld [vmem:[%s1845_s4 + $0x40] sm:$0xff] (!%p259_p12)  ;;  %v312_v24 = vld [vmem:[%s1843_s2 + $0x10] sm:$0xff] (!%p259_p12) }
  0x28   : > { %v309_v16 = vld [vmem:[%s1648_s10 + $0x18] sm:$0xff] (!%p259_p12)  ;;  %v308_v17 = vld [vmem:[%s1648_s10 + $0x10] sm:$0xff] (!%p259_p12)  ;;  %524 = vperm.xlu0 (!%p259_p12), %1337, %v327_v13   ;;  %534 = vperm.xlu1 (!%p259_p12), %1338, %v329_v15   ;;  %v336_v23 = vld [vmem:[%s1845_s4 + $0x48] sm:$0xff] (!%p259_p12)  ;;  %s1210_s9 = sshll.u32 (!%p259_p12), %s1637_s26, 6  ;;  %s1113_s12 = sshll.u32 (!%p259_p12), %s1655_s13, 4  ;;  %s1790_s12 = int_to_ptr.vmem [resolvable:$true] %s1113_s12 }
  0x29   : > { %555 = vmatprep.subr.mxu1 (!%p259_p12), %v309_v16  ;;  %1098 = vst [vmem:[%s1655_s13 + $0x18] sm:$0xff] (!%p259_p12), %v309_v16  ;;  %1097 = vst [vmem:[%s1655_s13 + $0x10] sm:$0xff] (!%p259_p12), %v308_v17  ;;  %v331_v25 = vld [vmem:[%s1845_s4 + $0x20] sm:$0xff] (!%p259_p12)  ;;  %v332_v26 = vld [vmem:[%s1845_s4 + $0x28] sm:$0xff] (!%p259_p12)  ;;  %s274_s11 = scalar_lea.vmem (!%p259_p12), [#allocation3], %s1210_s9  ;;  %s1236_s14 = sshll.u32 (!%p259_p12), %s1198_s22, 8 }
  0x2a   : > { %556 = vmatpush1.msra.mxu1 (!%p259_p12), %v308_v17  ;;  %v313_v27 = vld [vmem:[%s1843_s2 + $0x18] sm:$0xff] (!%p259_p12)  ;;  %v337_v28 = vld [vmem:[%s1845_s4 + $0x50] sm:$0xff] (!%p259_p12)  ;;  %v339_v32 = vld [vmem:[%s1845_s4 + $0x60] sm:$0xff] (!%p259_p12)  ;;  %s1795_s17 = scalar_lea.hbm (!%p259_p12), %s1846_s5, %s1236_s14  ;;  %s1100_s23 = scalar_lea.sflag (!%p259_p12), [#allocation5], %s1637_s26 }
  0x2b   : > { %1216 = vmatmul.mubr.msk.f32.vlgmr.msra.gmra.mrb[0].mxu1 (!%p259_p12), %vm542_vm0, %v310_v18  ;;  %v338_v29 = vld [vmem:[%s1845_s4 + $0x58] sm:$0xff] (!%p259_p12)  ;;  %v333_v30 = vld [vmem:[%s1845_s4 + $0x30] sm:$0xff] (!%p259_p12)  ;;  %v340_v33 = vld [vmem:[%s1845_s4 + $0x68] sm:$0xff] (!%p259_p12)  ;;  %s1467_s22 = scalar_lea.vmem (!%p259_p12), %s1790_s12, 512 }
  0x2c   : > { %625 = vmatprep.mubr.f32.mxu1 (!%p259_p12), %v1531_v12  ;;  %529 = vperm.xlu0 (!%p259_p12), %1337, %v328_v19   ;;  %v334_v31 = vld [vmem:[%s1845_s4 + $0x38] sm:$0xff] (!%p259_p12)  ;;  %v341_v34 = vld [vmem:[%s1845_s4 + $0x70] sm:$0xff] (!%p259_p12)  ;;  %v343_v36 = vld [vmem:[%s1845_s4 + $0x80] sm:$0xff] (!%p259_p12)  ;;  %p1468_p13 = scmp.ne.s32.totalorder (!%p259_p12), %s1790_s12, %s1467_s22 }
  0x2d   : > { %539 = vperm.xlu1 %1338, %v330_v20   ;;  %v342_v35 = vld [vmem:[%s1845_s4 + $0x78] sm:$0xff]  ;;  %v345_v37 = vld [vmem:[%s274_s11 + $0x8] sm:$0xff]  ;;  %v344_v41 = vld [vmem:[%s274_s11] sm:$0xff] }
  0x2e   : > { %v347_v38 = vld [vmem:[%s274_s11 + $0x18] sm:$0xff]  ;;  %v353_v39 = vsub.f32 0.0, %v345_v37  ;;  %v346_v42 = vld [vmem:[%s274_s11 + $0x10] sm:$0xff]  ;;  %v352_v43 = vsub.f32 0.0, %v344_v41  ;;  %v349_v49 = vld [vmem:[%s274_s11 + $0x28] sm:$0xff]  ;;  %p1469_p0 = pnand %p1468_p13, %p1609_p6 }
  0x2f   : > { %1217 = vmatmul.mubr.msk.f32.gmra.mrb[2].mxu1 %vm542_vm0, %v311_v21  ;;  %v355_v40 = vsub.f32 0.0, %v347_v38  ;;  %v354_v44 = vsub.f32 0.0, %v346_v42  ;;  %v351_v50 = vld [vmem:[%s274_s11 + $0x38] sm:$0xff]  ;;  %v357_v51 = vsub.f32 0.0, %v349_v49  ;;  %v348_v53 = vld [vmem:[%s274_s11 + $0x20] sm:$0xff]  ;;  %v350_v54 = vld [vmem:[%s274_s11 + $0x30] sm:$0xff] }
  0x30   : > { %631 = vmatprep.mubr.f32.mxu1 %v1531_v12  ;;  %402 = vperm.xlu0 %1337, %v335_v22   ;;  %v362_v45 = vmul.f32 1.442695, %v353_v39  ;;  %v360_v47 = vmul.f32 1.442695, %v352_v43  ;;  %v359_v52 = vsub.f32 0.0, %v351_v50  ;;  %v356_v55 = vsub.f32 0.0, %v348_v53  ;;  %p1470_p1 = pneg %p1469_p0 }
  0x31   : > { %407 = vperm.xlu1 %1338, %v336_v23   ;;  %v366_v46 = vmul.f32 1.442695, %v355_v40  ;;  %v364_v48 = vmul.f32 1.442695, %v354_v44  ;;  %v358_v56 = vsub.f32 0.0, %v350_v54 }
  0x32   : > { %1339 = vpow2.f32 %v362_v45  ;;  %v370_v57 = vmul.f32 1.442695, %v357_v51  ;;  %v374_v58 = vmul.f32 1.442695, %v359_v52  ;;  %v368_v59 = vmul.f32 1.442695, %v356_v55 }
  0x33   : > { %1218 = vmatmul.mubr.msk.f32.gmra.mrb[4].mxu1 %vm542_vm0, %v312_v24  ;;  %1341 = vpow2.f32 %v366_v46  ;;  %v372_v60 = vmul.f32 1.442695, %v358_v56 }
  0x34   : > { %637 = vmatprep.mubr.f32.mxu1 %v1531_v12  ;;  %686 = vperm.xlu0 %1337, %v331_v25   ;;  %1343 = vpow2.f32 %v360_v47 }
  0x35   : > { %691 = vperm.xlu1 %1338, %v332_v26   ;;  %1345 = vpow2.f32 %v364_v48 }
  0x36   : > { %1347 = vpow2.f32 %v370_v57 }
  0x37   : > { %1219 = vmatmul.mubr.msk.f32.gmra.mrb[6].mxu1 %vm542_vm0, %v313_v27  ;;  %1349 = vpow2.f32 %v374_v58 }
  0x38   : > { %412 = vperm.xlu0 %1337, %v337_v28   ;;  %949 = vmatprep.mubr.f32.mxu1 %v1531_v12  ;;  %1351 = vpow2.f32 %v368_v59 }
  0x39   : > { %417 = vperm.xlu1 %1338, %v338_v29   ;;  %1353 = vpow2.f32 %v372_v60 }
  0x3c   : > { %696 = vperm.xlu0 %1337, %v333_v30   ;;  %v1340_v61 = vpop.eup %1339 }
  0x3d   : > { %701 = vperm.xlu1 %1338, %v334_v31   ;;  %v1342_v62 = vpop.eup %1341  ;;  %v377_v63 = vadd.f32 1.0, %v1340_v61 }
  0x3e   : > { %v1344_v0 = vpop.eup %1343  ;;  %v379_v1 = vadd.f32 1.0, %v1342_v62 }
  0x3f   : > { %v1346_v2 = vpop.eup %1345  ;;  %1355 = vrcp.f32 %v377_v63  ;;  %v376_v3 = vadd.f32 1.0, %v1344_v0 }
  0x40   : > { %855 = vperm.xlu0 %1337, %v339_v32   ;;  %v1348_v4 = vpop.eup %1347  ;;  %1357 = vrcp.f32 %v379_v1  ;;  %v378_v5 = vadd.f32 1.0, %v1346_v2 }
  0x41   : > { %860 = vperm.xlu1 %1338, %v340_v33   ;;  %v1350_v6 = vpop.eup %1349  ;;  %1359 = vrcp.f32 %v376_v3  ;;  %v381_v7 = vadd.f32 1.0, %v1348_v4 }
  0x42   : > { %v1352_v8 = vpop.eup %1351  ;;  %1361 = vrcp.f32 %v378_v5  ;;  %v383_v9 = vadd.f32 1.0, %v1350_v6 }
  0x43   : > { %v1354_v10 = vpop.eup %1353  ;;  %1363 = vrcp.f32 %v381_v7  ;;  %v380_v11 = vadd.f32 1.0, %v1352_v8 }
  0x44   : > { %865 = vperm.xlu0 %1337, %v341_v34   ;;  %1365 = vrcp.f32 %v383_v9  ;;  %v382_v13 = vadd.f32 1.0, %v1354_v10  ;;  %v318_v34 = vld [vmem:[%s1844_s3 + $0x20] sm:$0xff] }
  0x45   : > { %870 = vperm.xlu1 %1338, %v342_v35   ;;  %1367 = vrcp.f32 %v380_v11  ;;  %v319_v35 = vld [vmem:[%s1844_s3 + $0x28] sm:$0xff] }
  0x46   : > { %1369 = vrcp.f32 %v382_v13 }
  0x48   : > { %1016 = vperm.xlu0 %1337, %v343_v36   ;;  %v320_v36 = vld [vmem:[%s1844_s3 + $0x30] sm:$0xff] }
  0x49   : > { %v1356_v14 = vpop.eup %1355 }
  0x4a   : > { %v1358_v15 = vpop.eup %1357  ;;  %v393_v16 = vmul.f32 %v1356_v14, %v345_v37  ;;  %v321_v37 = vld [vmem:[%s1844_s3 + $0x38] sm:$0xff] }
  0x4b   : > { %v1360_v17 = vpop.eup %1359  ;;  %v395_v18 = vmul.f32 %v1358_v15, %v347_v38 }
  0x4c   : > { %v1362_v19 = vpop.eup %1361  ;;  %v392_v20 = vmul.f32 %v1360_v17, %v344_v41 }
  0x4d   : > { %v1364_v21 = vpop.eup %1363  ;;  %v1237_v22 = vpack.c.bf16 %v395_v18, %v393_v16  ;;  %v394_v23 = vmul.f32 %v1362_v19, %v346_v42 }
  0x4e   : > { %v1366_v24 = vpop.eup %1365  ;;  %v397_v25 = vmul.f32 %v1364_v21, %v349_v49 }
  0x4f   : > { %v1368_v26 = vpop.eup %1367  ;;  %1238 = vmatprep.subr.bf16.mxu0 %v1237_v22  ;;  %v1239_v27 = vpack.c.bf16 %v394_v23, %v392_v20  ;;  %v399_v28 = vmul.f32 %v1366_v24, %v351_v50 }
  0x50   : > { %v1370_v29 = vpop.eup %1369  ;;  %v396_v30 = vmul.f32 %v1368_v26, %v348_v53 }
  0x51   : > { %1240 = vmatpush1.bf16.msra.mxu0 %v1239_v27  ;;  %v1241_v31 = vpack.c.bf16 %v399_v28, %v397_v25  ;;  %v398_v32 = vmul.f32 %v1370_v29, %v350_v54 }
  0x53   : > { %1242 = vmatprep.subr.bf16.mxu0 %v1241_v31  ;;  %v1243_v33 = vpack.c.bf16 %v398_v32, %v396_v30 }
  0x55   : > { %1244 = vmatpush1.bf16.msra.mxu0 %v1243_v33 }
  0x58   : > { %1212 = vmatmul.mubr.msk.f32.vlgmr.msra.gmra.mrb[0].mxu0 %vm420_vm1, %v318_v34 }
  0x59   : > { %503 = vmatprep.mubr.f32.mxu0 %v1531_v12 }
  0x5c   : > { %1213 = vmatmul.mubr.msk.f32.gmra.mrb[2].mxu0 %vm420_vm1, %v319_v35 }
  0x5d   : > { %509 = vmatprep.mubr.f32.mxu0 %v1531_v12 }
  0x60   : > { %1214 = vmatmul.mubr.msk.f32.gmra.mrb[4].mxu0 %vm420_vm1, %v320_v36 }
  0x61   : > { %515 = vmatprep.mubr.f32.mxu0 %v1531_v12 }
  0x64   : > { %1215 = vmatmul.mubr.msk.f32.gmra.mrb[6].mxu0 %vm420_vm1, %v321_v37 }
  0x65   : > { %780 = vmatprep.mubr.f32.mxu0 %v1531_v12 }
  0xa7   : > { %v525_v38 = vpop.permute.xlu0 %524  ;;  %v535_v50 = vpop.permute.xlu1 %534 }
  0xab   : > { %v530_v44 = vpop.permute.xlu0 %529 }
  0xac   : > { %v540_v62 = vpop.permute.xlu1 %539 }
  0xfe   : > { %v621_v39 = vpop.f32.mrb[0].mxu1 }
  0xff   : > { %v622_v40 = vadd.f32 %v621_v39, %v525_v38  ;;  %v623_v41 = vpop.f32.mrb[1].mxu1  ;;  %v314_v39 = vld [vmem:[%s1844_s3] sm:$0xff] }
 0x100   : > { %v624_v42 = vadd.f32 %v623_v41, %v525_v38  ;;  %v316_v41 = vld [vmem:[%s1844_s3 + $0x10] sm:$0xff] }
 0x101   : > { %v644_v43 = vsub.f32 0.0, %v622_v40  ;;  %v315_v40 = vld [vmem:[%s1844_s3 + $0x8] sm:$0xff] }
 0x102   : > { %v645_v45 = vsub.f32 0.0, %v624_v42  ;;  %v627_v46 = vpop.f32.mrb[2].mxu1  ;;  %v317_v42 = vld [vmem:[%s1844_s3 + $0x18] sm:$0xff] }
 0x103   : > { %v652_v47 = vmul.f32 1.442695, %v644_v43  ;;  %v628_v48 = vadd.f32 %v627_v46, %v530_v44  ;;  %v629_v49 = vpop.f32.mrb[3].mxu1  ;;  %v403_v43 = vpop.permute.xlu0 %402 }
 0x104   : > { %v654_v51 = vmul.f32 1.442695, %v645_v45  ;;  %v630_v52 = vadd.f32 %v629_v49, %v530_v44  ;;  %v408_v44 = vpop.permute.xlu1 %407 }
 0x105   : > { %1371 = vpow2.f32 %v652_v47  ;;  %v646_v53 = vsub.f32 0.0, %v628_v48 }
 0x106   : > { %1373 = vpow2.f32 %v654_v51  ;;  %v647_v54 = vsub.f32 0.0, %v630_v52  ;;  %v633_v55 = vpop.f32.mrb[4].mxu1 }
 0x107   : > { %v656_v56 = vmul.f32 1.442695, %v646_v53  ;;  %v634_v57 = vadd.f32 %v633_v55, %v535_v50  ;;  %v635_v58 = vpop.f32.mrb[5].mxu1  ;;  %v687_v45 = vpop.permute.xlu0 %686 }
 0x108   : > { %v658_v59 = vmul.f32 1.442695, %v647_v54  ;;  %v636_v60 = vadd.f32 %v635_v58, %v535_v50  ;;  %v692_v46 = vpop.permute.xlu1 %691  ;;  %v1269_v47 = vadd.f32 %v687_v45, %v403_v43 }
 0x109   : > { %1375 = vpow2.f32 %v656_v56  ;;  %v648_v61 = vsub.f32 0.0, %v634_v57  ;;  %v1273_v53 = vadd.f32 %v692_v46, %v408_v44 }
 0x10a   : > { %1377 = vpow2.f32 %v658_v59  ;;  %v649_v63 = vsub.f32 0.0, %v636_v60  ;;  %v639_v0 = vpop.f32.mrb[6].mxu1 }
 0x10b   : > { %v660_v1 = vmul.f32 1.442695, %v648_v61  ;;  %v640_v2 = vadd.f32 %v639_v0, %v540_v62  ;;  %v641_v3 = vpop.f32.mrb[7].mxu1  ;;  %v413_v48 = vpop.permute.xlu0 %412 }
 0x10c   : > { %v662_v4 = vmul.f32 1.442695, %v649_v63  ;;  %v642_v5 = vadd.f32 %v641_v3, %v540_v62  ;;  %v418_v55 = vpop.permute.xlu1 %417 }
 0x10d   : > { %1379 = vpow2.f32 %v660_v1  ;;  %v650_v6 = vsub.f32 0.0, %v640_v2 }
 0x10e   : > { %v651_v7 = vsub.f32 0.0, %v642_v5  ;;  %1381 = vpow2.f32 %v662_v4 }
 0x10f   : > { %v1372_v8 = vpop.eup %1371  ;;  %v664_v9 = vmul.f32 1.442695, %v650_v6  ;;  %v697_v61 = vpop.permute.xlu0 %696 }
 0x110   : > { %v1374_v10 = vpop.eup %1373  ;;  %v668_v11 = vadd.f32 1.0, %v1372_v8  ;;  %v666_v13 = vmul.f32 1.442695, %v651_v7  ;;  %v1277_v0 = vadd.f32 %v697_v61, %v413_v48  ;;  %v702_v7 = vpop.permute.xlu1 %701 }
 0x111   : > { %v669_v14 = vadd.f32 1.0, %v1374_v10  ;;  %1383 = vpow2.f32 %v664_v9  ;;  %v1281_v10 = vadd.f32 %v702_v7, %v418_v55  ;;  %v325_v55 = vld [vmem:[%s1844_s3 + $0x58] sm:$0xff] }
 0x112   : > { %1385 = vrcp.f32 %v668_v11 }
 0x113   : > { %v1376_v15 = vpop.eup %1375  ;;  %1387 = vpow2.f32 %v666_v13 }
 0x114   : > { %v1378_v16 = vpop.eup %1377  ;;  %v670_v17 = vadd.f32 1.0, %v1376_v15  ;;  %1389 = vrcp.f32 %v669_v14 }
 0x115   : > { %v671_v18 = vadd.f32 1.0, %v1378_v16 }
 0x116   : > { %1391 = vrcp.f32 %v670_v17 }
 0x117   : > { %v1380_v19 = vpop.eup %1379  ;;  %1393 = vrcp.f32 %v671_v18 }
 0x118   : > { %v1382_v20 = vpop.eup %1381  ;;  %v672_v21 = vadd.f32 1.0, %v1380_v19 }
 0x119   : > { %v673_v23 = vadd.f32 1.0, %v1382_v20 }
 0x11a   : > { %1395 = vrcp.f32 %v672_v21 }
 0x11b   : > { %v1384_v22 = vpop.eup %1383 }
 0x11c   : > { %v674_v24 = vadd.f32 1.0, %v1384_v22  ;;  %v1386_v25 = vpop.eup %1385 }
 0x11d   : > { %v1388_v26 = vpop.eup %1387 }
 0x11e   : > { %1397 = vrcp.f32 %v674_v24  ;;  %v1390_v27 = vpop.eup %1389  ;;  %v675_v28 = vadd.f32 1.0, %v1388_v26 }
 0x11f   : > { %1399 = vrcp.f32 %v673_v23 }
 0x120   : > { %v1392_v29 = vpop.eup %1391  ;;  %1401 = vrcp.f32 %v675_v28 }
 0x121   : > { %v1394_v30 = vpop.eup %1393  ;;  %v1247_v31 = vpack.c.bf16 %v1392_v29, %v1386_v25 }
 0x122   : > { %v1245_v32 = vpack.c.bf16 %v1394_v30, %v1390_v27 }
 0x124   : > { %1246 = vmatprep.subr.bf16.mxu0 %v1245_v32  ;;  %v1396_v33 = vpop.eup %1395 }
 0x125   : > { %1248 = vmatpush1.bf16.msra.mxu0 %v1247_v31 }
 0x128   : > { %v1398_v34 = vpop.eup %1397 }
 0x129   : > { %v1251_v35 = vpack.c.bf16 %v1398_v34, %v1396_v33  ;;  %v1400_v36 = vpop.eup %1399 }
 0x12a   : > { %v1402_v37 = vpop.eup %1401 }
 0x12b   : > { %v1249_v38 = vpack.c.bf16 %v1402_v37, %v1400_v36 }
 0x12d   : > { %1250 = vmatprep.subr.bf16.mxu0 %v1249_v38 }
 0x12e   : > { %1252 = vmatpush1.bf16.msra.mxu0 %v1251_v35 }
 0x131   : > { %1220 = vmatmul.mubr.msk.f32.vlgmr.msra.gmra.mrb[0].mxu0 %vm420_vm1, %v314_v39 }
 0x132   : > { %786 = vmatprep.mubr.f32.mxu0 %v1531_v12 }
 0x135   : > { %1221 = vmatmul.mubr.msk.f32.gmra.mrb[2].mxu0 %vm420_vm1, %v315_v40 }
 0x136   : > { %792 = vmatprep.mubr.f32.mxu0 %v1531_v12 }
 0x139   : > { %1222 = vmatmul.mubr.msk.f32.gmra.mrb[4].mxu0 %vm420_vm1, %v316_v41 }
 0x13a   : > { %798 = vmatprep.mubr.f32.mxu0 %v1531_v12 }
 0x13d   : > { %1223 = vmatmul.mubr.msk.f32.gmra.mrb[6].mxu0 %vm420_vm1, %v317_v42 }
 0x204   : > { %v782_v49 = vpop.f32.mrb[0].mxu0 }
 0x205   : > { %v1270_v50 = vadd.f32 %v1269_v47, %v782_v49  ;;  %v784_v51 = vpop.f32.mrb[1].mxu0 }
 0x206   : > { %v1272_v52 = vadd.f32 %v1269_v47, %v784_v51 }
 0x207   : > { %v813_v54 = vsub.f32 0.0, %v1270_v50 }
 0x208   : > { %v814_v56 = vsub.f32 0.0, %v1272_v52  ;;  %v788_v57 = vpop.f32.mrb[2].mxu0  ;;  %v322_v52 = vld [vmem:[%s1844_s3 + $0x40] sm:$0xff] }
 0x209   : > { %v821_v58 = vmul.f32 1.442695, %v813_v54  ;;  %v1274_v59 = vadd.f32 %v1273_v53, %v788_v57  ;;  %v790_v60 = vpop.f32.mrb[3].mxu0  ;;  %v324_v54 = vld [vmem:[%s1844_s3 + $0x50] sm:$0xff] }
 0x20a   : > { %v823_v62 = vmul.f32 1.442695, %v814_v56  ;;  %v1276_v63 = vadd.f32 %v1273_v53, %v790_v60  ;;  %v323_v53 = vld [vmem:[%s1844_s3 + $0x48] sm:$0xff]  ;;  %v856_v56 = vpop.permute.xlu0 %855 }
 0x20b   : > { %1403 = vpow2.f32 %v821_v58  ;;  %v815_v1 = vsub.f32 0.0, %v1274_v59 }
 0x20c   : > { %1405 = vpow2.f32 %v823_v62  ;;  %v816_v2 = vsub.f32 0.0, %v1276_v63  ;;  %v794_v3 = vpop.f32.mrb[4].mxu0  ;;  %v861_v62 = vpop.permute.xlu1 %860 }
 0x20d   : > { %v825_v4 = vmul.f32 1.442695, %v815_v1  ;;  %v1278_v5 = vadd.f32 %v1277_v0, %v794_v3  ;;  %v796_v6 = vpop.f32.mrb[5].mxu0 }
 0x20e   : > { %v827_v8 = vmul.f32 1.442695, %v816_v2  ;;  %v1280_v9 = vadd.f32 %v1277_v0, %v796_v6  ;;  %v866_v7 = vpop.permute.xlu0 %865 }
 0x20f   : > { %1407 = vpow2.f32 %v825_v4  ;;  %v817_v11 = vsub.f32 0.0, %v1278_v5 }
 0x210   : > { %1409 = vpow2.f32 %v827_v8  ;;  %v818_v13 = vsub.f32 0.0, %v1280_v9  ;;  %v800_v14 = vpop.f32.mrb[6].mxu0 }
 0x211   : > { %v829_v15 = vmul.f32 1.442695, %v817_v11  ;;  %v1282_v16 = vadd.f32 %v1281_v10, %v800_v14  ;;  %v802_v17 = vpop.f32.mrb[7].mxu0 }
 0x212   : > { %v831_v18 = vmul.f32 1.442695, %v818_v13  ;;  %v1284_v19 = vadd.f32 %v1281_v10, %v802_v17 }
 0x213   : > { %1411 = vpow2.f32 %v829_v15  ;;  %v819_v20 = vsub.f32 0.0, %v1282_v16  ;;  %v871_v16 = vpop.permute.xlu1 %870 }
 0x214   : > { %v820_v21 = vsub.f32 0.0, %v1284_v19  ;;  %1413 = vpow2.f32 %v831_v18 }
 0x215   : > { %v1404_v22 = vpop.eup %1403  ;;  %v833_v23 = vmul.f32 1.442695, %v819_v20 }
 0x216   : > { %v1406_v24 = vpop.eup %1405  ;;  %v837_v25 = vadd.f32 1.0, %v1404_v22  ;;  %v835_v26 = vmul.f32 1.442695, %v820_v21 }
 0x217   : > { %v838_v27 = vadd.f32 1.0, %v1406_v24  ;;  %1415 = vpow2.f32 %v833_v23 }
 0x218   : > { %1417 = vrcp.f32 %v837_v25 }
 0x219   : > { %v1408_v28 = vpop.eup %1407  ;;  %1419 = vpow2.f32 %v835_v26 }
 0x21a   : > { %v1410_v29 = vpop.eup %1409  ;;  %v839_v30 = vadd.f32 1.0, %v1408_v28  ;;  %1421 = vrcp.f32 %v838_v27 }
 0x21b   : > { %v840_v31 = vadd.f32 1.0, %v1410_v29 }
 0x21c   : > { %1423 = vrcp.f32 %v839_v30 }
 0x21d   : > { %v1412_v32 = vpop.eup %1411  ;;  %1425 = vrcp.f32 %v840_v31 }
 0x21e   : > { %v1414_v33 = vpop.eup %1413  ;;  %v841_v34 = vadd.f32 1.0, %v1412_v32 }
 0x21f   : > { %v842_v36 = vadd.f32 1.0, %v1414_v33 }
 0x220   : > { %1427 = vrcp.f32 %v841_v34 }
 0x221   : > { %v1416_v35 = vpop.eup %1415 }
 0x222   : > { %v843_v37 = vadd.f32 1.0, %v1416_v35  ;;  %v1418_v38 = vpop.eup %1417 }
 0x223   : > { %v1420_v39 = vpop.eup %1419 }
 0x224   : > { %1429 = vrcp.f32 %v843_v37  ;;  %v1422_v40 = vpop.eup %1421  ;;  %v844_v41 = vadd.f32 1.0, %v1420_v39 }
 0x225   : > { %1431 = vrcp.f32 %v842_v36 }
 0x226   : > { %v1424_v42 = vpop.eup %1423  ;;  %1433 = vrcp.f32 %v844_v41 }
 0x227   : > { %v1426_v43 = vpop.eup %1425  ;;  %v1255_v44 = vpack.c.bf16 %v1424_v42, %v1418_v38 }
 0x228   : > { %v1253_v45 = vpack.c.bf16 %v1426_v43, %v1422_v40 }
 0x22a   : > { %1254 = vmatprep.subr.bf16.mxu1 %v1253_v45  ;;  %v1428_v46 = vpop.eup %1427 }
 0x22b   : > { %1256 = vmatpush1.bf16.msra.mxu1 %v1255_v44 }
 0x22e   : > { %v1430_v47 = vpop.eup %1429 }
 0x22f   : > { %v1259_v48 = vpack.c.bf16 %v1430_v47, %v1428_v46  ;;  %v1432_v49 = vpop.eup %1431 }
 0x230   : > { %v1434_v50 = vpop.eup %1433 }
 0x231   : > { %v1257_v51 = vpack.c.bf16 %v1434_v50, %v1432_v49 }
 0x233   : > { %1258 = vmatprep.subr.bf16.mxu1 %v1257_v51 }
 0x234   : > { %1260 = vmatpush1.bf16.msra.mxu1 %v1259_v48 }
 0x237   : > { %1224 = vmatmul.mubr.msk.f32.vlgmr.msra.gmra.mrb[8].mxu1 %vm420_vm1, %v322_v52 }
 0x238   : > { %955 = vmatprep.mubr.f32.mxu1 %v1531_v12 }
 0x23b   : > { %1225 = vmatmul.mubr.msk.f32.gmra.mrb[10].mxu1 %vm420_vm1, %v323_v53 }
 0x23c   : > { %961 = vmatprep.mubr.f32.mxu1 %v1531_v12 }
 0x23f   : > { %1226 = vmatmul.mubr.msk.f32.gmra.mrb[12].mxu1 %vm420_vm1, %v324_v54 }
 0x240   : > { %967 = vmatprep.mubr.f32.mxu1 %v1531_v12 }
 0x243   : > { %1227 = vmatmul.mubr.msk.f32.gmra.mrb[14].mxu1 %vm420_vm1, %v325_v55 }
 0x244   : > { %1086 = vmatprep.mubr.f32.mxu1 %v1531_v12 }
 0x30a   : > { %v951_v57 = vpop.f32.mrb[8].mxu1 }
 0x30b   : > { %v952_v58 = vadd.f32 %v951_v57, %v856_v56  ;;  %v953_v59 = vpop.f32.mrb[9].mxu1  ;;  %v1017_v57 = vpop.permute.xlu0 %1016 }
 0x30c   : > { %v954_v60 = vadd.f32 %v953_v59, %v856_v56  ;;  %v326_v56 = vld [vmem:[%s1844_s3 + $0x60] sm:$0xff] }
 0x30d   : > { %v974_v61 = vsub.f32 0.0, %v952_v58  ;;  %v306_v58 = vld [vmem:[%s1648_s10] sm:$0xff] }
 0x30e   : > { %v975_v63 = vsub.f32 0.0, %v954_v60  ;;  %v957_v0 = vpop.f32.mrb[10].mxu1 }
 0x30f   : > { %v982_v1 = vmul.f32 1.442695, %v974_v61  ;;  %v958_v2 = vadd.f32 %v957_v0, %v861_v62  ;;  %v959_v3 = vpop.f32.mrb[11].mxu1  ;;  %v307_v61 = vld [vmem:[%s1648_s10 + $0x8] sm:$0xff]  ;;  %s1533_s10 = smov [#allocation4]  }
 0x310   : > { %v984_v4 = vmul.f32 1.442695, %v975_v63  ;;  %v960_v5 = vadd.f32 %v959_v3, %v861_v62  ;;  %s1471_s25 = sshll.u32 %s1533_s10, 4  ;;  %s1472_s25 = int_to_ptr.vmem [resolvable:$false] %s1471_s25 }
 0x311   : > { %1435 = vpow2.f32 %v982_v1  ;;  %v976_v6 = vsub.f32 0.0, %v958_v2  ;;  %s1473_s28 = scalar_lea.vmem %s1472_s25, 1024  ;;  %p1474_p2 = scmp.lt.s32.totalorder %s1790_s12, %s1472_s25 }
 0x312   : > { %1437 = vpow2.f32 %v984_v4  ;;  %v977_v8 = vsub.f32 0.0, %v960_v5  ;;  %v963_v12 = vpop.f32.mrb[12].mxu1  ;;  %p1475_p3 = scmp.lt.s32.totalorder %s1473_s28, %s1467_s22 }
 0x313   : > { %v986_v9 = vmul.f32 1.442695, %v976_v6  ;;  %v964_v10 = vadd.f32 %v963_v12, %v866_v7  ;;  %v965_v11 = vpop.f32.mrb[13].mxu1 }
 0x314   : > { %v988_v13 = vmul.f32 1.442695, %v977_v8  ;;  %v966_v14 = vadd.f32 %v965_v11, %v866_v7  ;;  %p1476_p4 = por %p1475_p3, %p1474_p2 }
 0x315   : > { %1439 = vpow2.f32 %v986_v9  ;;  %v978_v15 = vsub.f32 0.0, %v964_v10 }
 0x316   : > { %1441 = vpow2.f32 %v988_v13  ;;  %v979_v17 = vsub.f32 0.0, %v966_v14  ;;  %v969_v18 = vpop.f32.mrb[14].mxu1  ;;  %p1477_p5 = pnand %p1476_p4, %p1470_p1 }
 0x317   : > { %v990_v19 = vmul.f32 1.442695, %v978_v15  ;;  %v970_v20 = vadd.f32 %v969_v18, %v871_v16  ;;  %v971_v21 = vpop.f32.mrb[15].mxu1 }
 0x318   : > { %v992_v22 = vmul.f32 1.442695, %v979_v17  ;;  %v972_v23 = vadd.f32 %v971_v21, %v871_v16 }
 0x319   : > { %1443 = vpow2.f32 %v990_v19  ;;  %v980_v24 = vsub.f32 0.0, %v970_v20 }
 0x31a   : > { %v981_v25 = vsub.f32 0.0, %v972_v23  ;;  %1445 = vpow2.f32 %v992_v22 }
 0x31b   : > { %v1436_v26 = vpop.eup %1435  ;;  %v994_v27 = vmul.f32 1.442695, %v980_v24 }
 0x31c   : > { %v1438_v28 = vpop.eup %1437  ;;  %v998_v29 = vadd.f32 1.0, %v1436_v26  ;;  %v996_v30 = vmul.f32 1.442695, %v981_v25 }
 0x31d   : > { %v999_v31 = vadd.f32 1.0, %v1438_v28  ;;  %1447 = vpow2.f32 %v994_v27 }
 0x31e   : > { %1449 = vrcp.f32 %v998_v29 }
 0x31f   : > { %v1440_v32 = vpop.eup %1439  ;;  %1451 = vpow2.f32 %v996_v30 }
 0x320   : > { %v1442_v33 = vpop.eup %1441  ;;  %v1000_v34 = vadd.f32 1.0, %v1440_v32  ;;  %1453 = vrcp.f32 %v999_v31 }
 0x321   : > { %v1001_v35 = vadd.f32 1.0, %v1442_v33 }
 0x322   : > { %1455 = vrcp.f32 %v1000_v34 }
 0x323   : > { %v1444_v36 = vpop.eup %1443  ;;  %1457 = vrcp.f32 %v1001_v35 }
 0x324   : > { %v1446_v37 = vpop.eup %1445  ;;  %v1002_v38 = vadd.f32 1.0, %v1444_v36 }
 0x325   : > { %v1003_v40 = vadd.f32 1.0, %v1446_v37 }
 0x326   : > { %1459 = vrcp.f32 %v1002_v38 }
 0x327   : > { %v1448_v39 = vpop.eup %1447 }
 0x328   : > { %v1004_v41 = vadd.f32 1.0, %v1448_v39  ;;  %v1450_v42 = vpop.eup %1449 }
 0x329   : > { %v1452_v43 = vpop.eup %1451 }
 0x32a   : > { %1461 = vrcp.f32 %v1004_v41  ;;  %v1454_v44 = vpop.eup %1453  ;;  %v1005_v45 = vadd.f32 1.0, %v1452_v43 }
 0x32b   : > { %1463 = vrcp.f32 %v1003_v40 }
 0x32c   : > { %v1456_v46 = vpop.eup %1455  ;;  %1465 = vrcp.f32 %v1005_v45 }
 0x32d   : > { %v1458_v47 = vpop.eup %1457  ;;  %v1263_v48 = vpack.c.bf16 %v1456_v46, %v1450_v42 }
 0x32e   : > { %v1261_v49 = vpack.c.bf16 %v1458_v47, %v1454_v44 }
 0x330   : > { %1262 = vmatprep.subr.bf16.mxu1 %v1261_v49  ;;  %v1460_v50 = vpop.eup %1459 }
 0x331   : > { %1264 = vmatpush1.bf16.msra.mxu1 %v1263_v48 }
 0x334   : > { %v1462_v51 = vpop.eup %1461 }
 0x335   : > { %v1267_v52 = vpack.c.bf16 %v1462_v51, %v1460_v50  ;;  %v1464_v53 = vpop.eup %1463 }
 0x336   : > { %v1466_v54 = vpop.eup %1465 }
 0x337   : > { %v1265_v55 = vpack.c.bf16 %v1466_v54, %v1464_v53 }
 0x339   : > { %1266 = vmatprep.subr.bf16.mxu1 %v1265_v55 }
 0x33a   : > { %1268 = vmatpush1.bf16.msra.mxu1 %v1267_v52 }
 0x33d   : > { %1228 = vmatmul.mubr.msk.f32.vlgmr.msra.gmra.mrb[16].mxu1 %vm420_vm1, %v326_v56 }
 0x410   : > { %v1088_v59 = vpop.f32.mrb[16].mxu1 }
 0x411   : > { %v1089_v60 = vadd.f32 %v1088_v59, %v1017_v57  ;;  %v1090_v62 = vpop.f32.mrb[17].mxu1 }
 0x412   : > { %v1091_v63 = vadd.f32 %v1090_v62, %v1017_v57 }
 0x413   : > { %v1093_v0 = vadd.f32 %v1089_v60, %v306_v58 }
 0x414   : > { %v1094_v1 = vadd.f32 %v1091_v63, %v307_v61 }
 0x415   : > { %1095 = vst [vmem:[%s1655_s13] sm:$0xff] %v1093_v0 }
 0x416   : > { %1096 = vst [vmem:[%s1655_s13 + $0x8] sm:$0xff] %v1094_v1 }
 0x417   : > { %1480 = shalt.err (!%p1477_p5)
}
 0x418   : > { %s1481_s13 = scalar_lea.hbm %s1795_s17, 512  ;;  %s1485_s8 = scalar_lea.hbm %s1846_s5, 1024 }
 0x419   : > { %p1482_p7 = scmp.ne.s32.totalorder %s1795_s17, %s1481_s13  ;;  %p1486_p12 = scmp.lt.u32.totalorder %s1795_s17, %s1846_s5 }
 0x41a   : > { %p1487_p13 = scmp.lt.u32.totalorder %s1485_s8, %s1481_s13  ;;  %p1489_p1 = scmp.lt.u32.totalorder %s1481_s13, %s1795_s17 }
 0x41b   : > { %p1483_p10 = pnand %p1482_p7, %p1609_p6 }
 0x41c   : > { %p1488_p0 = por %p1487_p13, %p1486_p12 }
 0x41d   : > { %p1484_p11 = pneg %p1483_p10 }
 0x41e   : > { %p1490_p2 = por %p1489_p1, %p1488_p0 }
 0x420   : > { %p1491_p3 = pnand %p1490_p2, %p1484_p11 }
 0x422   : > { %1494 = shalt.err (!%p1491_p3)
}
 0x423   : > { %s1534_s14 = smov 256   ;;  %s1535_s15 = smov 512  }
 0x424   : > { %s1536_s16 = smov 16  }
 0x425   : > { %1293 = dma.vmem_to_hbm [thread:$0]  (%p1609_p6), %s1790_s12, 512, %s1795_s17, %s1100_s23, %s1534_s14, %s1535_s15, %s1536_s16  }
 0x426 PF: > { %s1128_s22 = sand.u32 1, %s1517_s18   ;;  %p1296_p4 = pnand %p1201_p9, %p1613_p8 }
 0x427   : > { %s1129_s10 = scalar_lea.sflag [#allocation5], %s1128_s22 }
 0x428   : > { %1512 = dma.done.wait (!%p1296_p4), %s1129_s10, 512  }
 0x429   : > { %1514 = vsyncadd (!%p1296_p4), %s1129_s10, 4294966784  ;;  %p15_p5 = scmp.ge.s32.totalorder %s1590_s24, 4   ;;  %s1850_s18 = smov %s1521_s19 }
 0x42a   : > { %s1851_s19 = smov %s1525_s20  ;;  %s1852_s20 = smov %s1603_s27 }
 0x42b   : > { %s1853_s21 = smov %s1590_s24  ;;  %17 = sbr.rel (!%p15_p5) target bundleno = 3 (0x3), region = 134 }
 0x432   :  { %1134 = vsyncpa [#allocation5], 1 }
 0x433   :  { %1136 = vsyncpa [#allocation5 + $0x1], 1 }

</bundles_post_ra>
